<compile_context>
chip_gen: v7x
topology: tpu7x:2x2x1
jax: 0.10.0
libtpu: 0.0.40
codegen_flags: <defaults>
</compile_context>

<pallas_src>
import functools

import jax
import jax.numpy as jnp
from jax import lax
from jax.experimental import pallas as pl
from jax.experimental.pallas import tpu as pltpu


def _round_up(v, m):
    return (v + m - 1) // m * m


def _as_i32(v):
    """Reinterpret a python int (possibly >= 2**31) as a signed 32-bit value."""
    v &= 0xFFFFFFFF
    return v - (1 << 32) if v >= (1 << 31) else v


# lowbias32-style finalizer constants (int32-wrapped).
_M1 = _as_i32(0x7FEB352D)
_M2 = _as_i32(0x846CA68B)
_GOLDEN = _as_i32(0x9E3779B9)


def _mix32(x):
    """Bijective 32-bit mixer on int32 arrays (logical shifts emulated via mask)."""
    x = x ^ ((x >> 16) & 0xFFFF)
    x = x * jnp.int32(_M1)
    x = x ^ ((x >> 15) & 0x1FFFF)
    x = x * jnp.int32(_M2)
    x = x ^ ((x >> 16) & 0xFFFF)
    return x


def _gate_kernel(seed_ref, x_ref, w1_ref, w2_ref, out_ref, *,
                 num_selects, num_experts, use_softmax):
    TB = x_ref.shape[0]
    Ep = w2_ref.shape[1]            # lane-padded expert axis (multiple of 128)
    OW = out_ref.shape[1]           # lane-padded packed output width (multiple of 128)
    K = num_selects
    E = num_experts

    idx_bits = max(1, (Ep - 1).bit_length())   # bits needed to encode an expert column
    rand_bits = 31 - idx_bits                  # keep key positive in int32
    idx_mask = (1 << idx_bits) - 1

    # logits = tanh(x @ W1) @ W2 -- bf16 operands on the MXU, f32 accumulation.
    h = jnp.tanh(jnp.dot(x_ref[...], w1_ref[...],
                         preferred_element_type=jnp.float32))
    logits = jnp.dot(h.astype(w2_ref.dtype), w2_ref[...],
                     preferred_element_type=jnp.float32)             # (TB, Ep) f32

    # Portable counter-based PRNG: one hashed int32 per (token, expert).
    row = lax.broadcasted_iota(jnp.int32, (TB, Ep), 0) + pl.program_id(0) * TB
    col = lax.broadcasted_iota(jnp.int32, (TB, Ep), 1)
    ctr = row * jnp.int32(Ep) + col + seed_ref[0] * jnp.int32(_GOLDEN)
    bits = _mix32(ctr)

    # Packed key: high bits = random value, low bits = column index. All valid keys
    # are distinct and >= 0; padded columns get -1 so they are never selected.
    rand_hi = (bits >> (idx_bits + 1)) & ((1 << rand_bits) - 1)
    key = (rand_hi << idx_bits) | col
    key = jnp.where(col < E, key, jnp.int32(-1))

    # Top-K over the random keys == K distinct experts drawn uniformly at random.
    # Per k: one max-reduce (winner key carries its own index) + one sum-reduce gather.
    sel_idx = []
    sel_logit = []
    for _ in range(K):
        kmax = jnp.max(key, axis=1, keepdims=True)                   # (TB, 1)
        idx = kmax & jnp.int32(idx_mask)
        hit = col == idx
        g = jnp.sum(jnp.where(hit, logits, 0.0), axis=1, keepdims=True)
        sel_idx.append(idx)
        sel_logit.append(g)
        key = jnp.where(hit, jnp.int32(-1), key)                     # mark as used

    if use_softmax:
        m = sel_logit[0]
        for g in sel_logit[1:]:
            m = jnp.maximum(m, g)
        exps = [jnp.exp(g - m) for g in sel_logit]
        denom = exps[0]
        for e in exps[1:]:
            denom = denom + e
        scores = [e / denom for e in exps]          # exact normalization
    else:
        scores = sel_logit

    # One lane-dense (TB, OW) f32 store: scores in cols [0,K), indices (as f32,
    # exact for E < 2^24) in cols [K, 2K). Split / cast back in the wrapper.
    ocol = lax.broadcasted_iota(jnp.int32, (TB, OW), 1)
    out = jnp.zeros((TB, OW), jnp.float32)
    for k in range(K):
        out = jnp.where(ocol == k, scores[k], out)
        out = jnp.where(ocol == K + k, sel_idx[k].astype(jnp.float32), out)
    out_ref[...] = out


def random_learnable_gate(x, w1, w2, *, num_selects, seed=0,
                          block_tokens=512, use_softmax=True,
                          compute_dtype=jnp.bfloat16):
    """Forward of RandomLearnableGate.

    x: (B, H); w1: (H, E) first Linear weight (pre-transposed); w2: (E, E) second
    Linear weight (pre-transposed). Returns a dict like the PyTorch module.
    """
    B, H = x.shape
    Hw, E = w1.shape
    assert Hw == H and w2.shape == (E, E)
    K = num_selects
    assert 1 <= K <= E

    Ep = _round_up(E, 128)                         # lane-dense expert axis
    OW = _round_up(2 * K, 128)                     # packed lane-dense output width

    itemsize = jnp.dtype(compute_dtype).itemsize
    sub = {4: 8, 2: 16, 1: 32}[itemsize]           # sublane packing multiple per dtype
    TB = min(block_tokens, _round_up(B, sub))
    # Prefer >= 2 grid blocks when possible so v7x's two TensorCores both get work.
    if B > sub and _round_up(B, TB) // TB < 2:
        TB = _round_up((B + 1) // 2, sub)
    B_pad = _round_up(B, TB)
    nblk = B_pad // TB

    x_p = jnp.pad(x, ((0, B_pad - B), (0, 0))).astype(compute_dtype)
    w1_p = jnp.pad(w1, ((0, 0), (0, Ep - E))).astype(compute_dtype)
    w2_p = jnp.pad(w2, ((0, Ep - E), (0, Ep - E))).astype(compute_dtype)
    seed_arr = jnp.asarray([seed], dtype=jnp.int32)

    # VMEM budget: streamed x (double-buffered) + resident weights + packed output
    # + f32/i32 intermediates; clamped so it also fits v7x's 64 MiB VMEM.
    # TODO(synk): for very large H on v7x, split H with an extra "arbitrary" grid axis.
    est = (2 * TB * H * itemsize
           + 2 * (H * Ep + Ep * Ep) * itemsize
           + 2 * TB * OW * 4
           + 6 * TB * Ep * 4)
    vmem_limit = int(min(56 * 2 ** 20, max(32 * 2 ** 20, 2 * est)))

    kernel = functools.partial(_gate_kernel, num_selects=K, num_experts=E,
                               use_softmax=use_softmax)

    grid_spec = pltpu.PrefetchScalarGridSpec(
        num_scalar_prefetch=1,
        grid=(nblk,),
        in_specs=[
            pl.BlockSpec((TB, H), lambda i, s: (i, 0)),     # streamed token tile
            pl.BlockSpec((H, Ep), lambda i, s: (0, 0)),     # resident gate weights
            pl.BlockSpec((Ep, Ep), lambda i, s: (0, 0)),
        ],
        out_specs=pl.BlockSpec((TB, OW), lambda i, s: (i, 0)),
    )

    packed = pl.pallas_call(
        kernel,
        grid_spec=grid_spec,
        out_shape=jax.ShapeDtypeStruct((B_pad, OW), jnp.float32),
        compiler_params=pltpu.CompilerParams(
            dimension_semantics=("parallel",),
            vmem_limit_bytes=vmem_limit),
    )(seed_arr, x_p, w1_p, w2_p)

    scores = packed[:B, :K]
    idx = packed[:B, K:2 * K].astype(jnp.int32)

    return {
        'topK_indices': idx,
        'topK_scores': scores,
        'balance_loss': jnp.asarray(0, jnp.int32),
        'load': jnp.asarray(-1, jnp.int32),
        'importance': jnp.asarray(-1, jnp.int32),
    }


if __name__ == "__main__":
    # small config consistent with the module: tokens=8, input_size=32, experts=8, top-2
    B, H, E, K = 8, 32, 8, 2

    key = jax.random.PRNGKey(0)
    kx, k1, k2 = jax.random.split(key, 3)
    x = jax.random.normal(kx, (B, H), dtype=jnp.float32)
    # deterministic "kaiming-uniform-like" init of the bias-free mlp gate, pre-transposed
    w1 = jax.random.uniform(k1, (H, E), jnp.float32, -1.0, 1.0) / jnp.sqrt(H)
    w2 = jax.random.uniform(k2, (E, E), jnp.float32, -1.0, 1.0) / jnp.sqrt(E)

    out = random_learnable_gate(x, w1, w2, num_selects=K, seed=1234)
    jax.block_until_ready(out)

    idx = out['topK_indices']
    scores = out['topK_scores']

    # sanity: shapes, indices valid and distinct per row
    assert idx.shape == (B, K) and scores.shape == (B, K)
    assert bool(jnp.all((idx >= 0) & (idx < E)))
    assert bool(jnp.all(idx[:, 0] != idx[:, 1]))

    # sanity: scores == softmax of the logits gathered at the returned random indices
    logits_ref = jnp.tanh(x @ w1) @ w2
    gathered = jnp.take_along_axis(logits_ref, idx, axis=1)
    scores_ref = jax.nn.softmax(gathered.astype(jnp.float32), axis=1)
    assert jnp.allclose(scores, scores_ref, atol=1e-2)
    assert jnp.allclose(jnp.sum(scores, axis=1), 1.0, atol=1e-2)

    # constant outputs of the module
    assert int(out['balance_loss']) == 0
    assert int(out['load']) == -1
    assert int(out['importance']) == -1

    print("KERNEL_OK")
</pallas_src>

<mosaic_0001>
module attributes {stable_mosaic.version = 11 : i64} {
  func.func @_gate_kernel(%arg0: i32, %arg1: memref<1xi32, #tpu.memory_space<smem>>, %arg2: memref<16x32xbf16, #tpu.memory_space<vmem>>, %arg3: memref<32x128xbf16, #tpu.memory_space<vmem>>, %arg4: memref<128x128xbf16, #tpu.memory_space<vmem>>, %arg5: memref<16x128xf32, #tpu.memory_space<vmem>>) attributes {dimension_semantics = [#tpu.dimension_semantics<parallel>], iteration_bounds = array<i64: 1>, scalar_prefetch = 1 : i64, scratch_operands = 0 : i64, tpu.core_type = #tpu.core_type<tc>, window_params = [{transform_indices = @transform_0, window_bounds = array<i64: 16, 32>}, {pipeline_mode = #tpu.pipeline_mode<synchronous>, transform_indices = @transform_1, window_bounds = array<i64: 32, 128>}, {pipeline_mode = #tpu.pipeline_mode<synchronous>, transform_indices = @transform_2, window_bounds = array<i64: 128, 128>}, {transform_indices = @transform_3, window_bounds = array<i64: 16, 128>}]} {
    %c0 = arith.constant 0 : index
    %c0_0 = arith.constant 0 : index
    %0 = vector.load %arg2[%c0, %c0_0] : memref<16x32xbf16, #tpu.memory_space<vmem>>, vector<16x32xbf16>
    %c0_1 = arith.constant 0 : index
    %c0_2 = arith.constant 0 : index
    %1 = vector.load %arg3[%c0_1, %c0_2] : memref<32x128xbf16, #tpu.memory_space<vmem>>, vector<32x128xbf16>
    %cst = arith.constant dense<0.000000e+00> : vector<16x128xf32>
    %2 = tpu.matmul %0, %1, %cst {dimension_numbers = #tpu.dot_dimension_numbers<[1], [0], [0], [1], [0, 0, 1, 1], [], []>} : vector<16x32xbf16>, vector<32x128xbf16>, vector<16x128xf32> -> vector<16x128xf32>
    %3 = math.tanh %2 : vector<16x128xf32>
    %4 = arith.truncf %3 : vector<16x128xf32> to vector<16x128xbf16>
    %c0_3 = arith.constant 0 : index
    %c0_4 = arith.constant 0 : index
    %5 = vector.load %arg4[%c0_3, %c0_4] : memref<128x128xbf16, #tpu.memory_space<vmem>>, vector<128x128xbf16>
    %cst_5 = arith.constant dense<0.000000e+00> : vector<16x128xf32>
    %6 = tpu.matmul %4, %5, %cst_5 {dimension_numbers = #tpu.dot_dimension_numbers<[1], [0], [0], [1], [0, 0, 1, 1], [], []>} : vector<16x128xbf16>, vector<128x128xbf16>, vector<16x128xf32> -> vector<16x128xf32>
    %7 = tpu.iota {dimensions = array<i32: 0>} : vector<16x128xi32>
    %c16_i32 = arith.constant 16 : i32
    %8 = arith.muli %arg0, %c16_i32 : i32
    %9 = vector.broadcast %8 : i32 to vector<16x128xi32>
    %10 = arith.addi %7, %9 : vector<16x128xi32>
    %11 = tpu.iota {dimensions = array<i32: 1>} : vector<16x128xi32>
    %c128_i32 = arith.constant 128 : i32
    %12 = vector.broadcast %c128_i32 : i32 to vector<16x128xi32>
    %13 = arith.muli %10, %12 : vector<16x128xi32>
    %14 = arith.addi %13, %11 : vector<16x128xi32>
    %c0_6 = arith.constant 0 : index
    %15 = memref.load %arg1[%c0_6] : memref<1xi32, #tpu.memory_space<smem>>
    %c-1640531527_i32 = arith.constant -1640531527 : i32
    %16 = arith.muli %15, %c-1640531527_i32 : i32
    %17 = vector.broadcast %16 : i32 to vector<16x128xi32>
    %18 = arith.addi %14, %17 : vector<16x128xi32>
    %c16_i32_7 = arith.constant 16 : i32
    %19 = vector.broadcast %c16_i32_7 : i32 to vector<16x128xi32>
    %20 = arith.shrsi %18, %19 : vector<16x128xi32>
    %c65535_i32 = arith.constant 65535 : i32
    %21 = vector.broadcast %c65535_i32 : i32 to vector<16x128xi32>
    %22 = arith.andi %20, %21 : vector<16x128xi32>
    %23 = arith.xori %18, %22 : vector<16x128xi32>
    %c2146121005_i32 = arith.constant 2146121005 : i32
    %24 = vector.broadcast %c2146121005_i32 : i32 to vector<16x128xi32>
    %25 = arith.muli %23, %24 : vector<16x128xi32>
    %c15_i32 = arith.constant 15 : i32
    %26 = vector.broadcast %c15_i32 : i32 to vector<16x128xi32>
    %27 = arith.shrsi %25, %26 : vector<16x128xi32>
    %c131071_i32 = arith.constant 131071 : i32
    %28 = vector.broadcast %c131071_i32 : i32 to vector<16x128xi32>
    %29 = arith.andi %27, %28 : vector<16x128xi32>
    %30 = arith.xori %25, %29 : vector<16x128xi32>
    %c-2073254261_i32 = arith.constant -2073254261 : i32
    %31 = vector.broadcast %c-2073254261_i32 : i32 to vector<16x128xi32>
    %32 = arith.muli %30, %31 : vector<16x128xi32>
    %c16_i32_8 = arith.constant 16 : i32
    %33 = vector.broadcast %c16_i32_8 : i32 to vector<16x128xi32>
    %34 = arith.shrsi %32, %33 : vector<16x128xi32>
    %c65535_i32_9 = arith.constant 65535 : i32
    %35 = vector.broadcast %c65535_i32_9 : i32 to vector<16x128xi32>
    %36 = arith.andi %34, %35 : vector<16x128xi32>
    %37 = arith.xori %32, %36 : vector<16x128xi32>
    %c8_i32 = arith.constant 8 : i32
    %38 = vector.broadcast %c8_i32 : i32 to vector<16x128xi32>
    %39 = arith.shrsi %37, %38 : vector<16x128xi32>
    %c16777215_i32 = arith.constant 16777215 : i32
    %40 = vector.broadcast %c16777215_i32 : i32 to vector<16x128xi32>
    %41 = arith.andi %39, %40 : vector<16x128xi32>
    %c7_i32 = arith.constant 7 : i32
    %42 = vector.broadcast %c7_i32 : i32 to vector<16x128xi32>
    %43 = arith.shli %41, %42 : vector<16x128xi32>
    %44 = arith.ori %43, %11 : vector<16x128xi32>
    %c8_i32_10 = arith.constant 8 : i32
    %45 = vector.broadcast %c8_i32_10 : i32 to vector<16x128xi32>
    %46 = arith.cmpi slt, %11, %45 : vector<16x128xi32>
    %c-1_i32 = arith.constant -1 : i32
    %47 = vector.broadcast %c-1_i32 : i32 to vector<16x128xi32>
    %48 = arith.select %46, %44, %47 : vector<16x128xi1>, vector<16x128xi32>
    %cst_11 = arith.constant dense<-2147483648> : vector<16xi32>
    %49 = vector.multi_reduction <maxsi>, %48, %cst_11 [1] : vector<16x128xi32> to vector<16xi32>
    %50 = vector.shape_cast %49 : vector<16xi32> to vector<16x1xi32>
    %c127_i32 = arith.constant 127 : i32
    %51 = vector.broadcast %c127_i32 : i32 to vector<16x1xi32>
    %52 = arith.andi %50, %51 : vector<16x1xi32>
    %53 = vector.broadcast %52 : vector<16x1xi32> to vector<16x128xi32>
    %54 = arith.cmpi eq, %11, %53 : vector<16x128xi32>
    %cst_12 = arith.constant 0.000000e+00 : f32
    %55 = vector.broadcast %cst_12 : f32 to vector<16x128xf32>
    %56 = arith.select %54, %6, %55 : vector<16x128xi1>, vector<16x128xf32>
    %cst_13 = arith.constant dense<0.000000e+00> : vector<16xf32>
    %57 = vector.multi_reduction <add>, %56, %cst_13 [1] : vector<16x128xf32> to vector<16xf32>
    %58 = vector.shape_cast %57 : vector<16xf32> to vector<16x1xf32>
    %c-1_i32_14 = arith.constant -1 : i32
    %59 = vector.broadcast %c-1_i32_14 : i32 to vector<16x128xi32>
    %60 = arith.select %54, %59, %48 : vector<16x128xi1>, vector<16x128xi32>
    %cst_15 = arith.constant dense<-2147483648> : vector<16xi32>
    %61 = vector.multi_reduction <maxsi>, %60, %cst_15 [1] : vector<16x128xi32> to vector<16xi32>
    %62 = vector.shape_cast %61 : vector<16xi32> to vector<16x1xi32>
    %c127_i32_16 = arith.constant 127 : i32
    %63 = vector.broadcast %c127_i32_16 : i32 to vector<16x1xi32>
    %64 = arith.andi %62, %63 : vector<16x1xi32>
    %65 = vector.broadcast %64 : vector<16x1xi32> to vector<16x128xi32>
    %66 = arith.cmpi eq, %11, %65 : vector<16x128xi32>
    %cst_17 = arith.constant 0.000000e+00 : f32
    %67 = vector.broadcast %cst_17 : f32 to vector<16x128xf32>
    %68 = arith.select %66, %6, %67 : vector<16x128xi1>, vector<16x128xf32>
    %cst_18 = arith.constant dense<0.000000e+00> : vector<16xf32>
    %69 = vector.multi_reduction <add>, %68, %cst_18 [1] : vector<16x128xf32> to vector<16xf32>
    %70 = vector.shape_cast %69 : vector<16xf32> to vector<16x1xf32>
    %71 = arith.maximumf %58, %70 : vector<16x1xf32>
    %72 = arith.subf %58, %71 : vector<16x1xf32>
    %73 = math.exp %72 : vector<16x1xf32>
    %74 = arith.subf %70, %71 : vector<16x1xf32>
    %75 = math.exp %74 : vector<16x1xf32>
    %76 = arith.addf %73, %75 : vector<16x1xf32>
    %77 = arith.divf %73, %76 : vector<16x1xf32>
    %78 = arith.divf %75, %76 : vector<16x1xf32>
    %79 = tpu.iota {dimensions = array<i32: 1>} : vector<16x128xi32>
    %cst_19 = arith.constant 0.000000e+00 : f32
    %80 = vector.broadcast %cst_19 : f32 to vector<16x128xf32>
    %c0_i32 = arith.constant 0 : i32
    %81 = vector.broadcast %c0_i32 : i32 to vector<16x128xi32>
    %82 = arith.cmpi eq, %79, %81 : vector<16x128xi32>
    %83 = vector.shape_cast %77 : vector<16x1xf32> to vector<16x1xf32>
    %84 = vector.broadcast %83 : vector<16x1xf32> to vector<16x128xf32>
    %85 = arith.select %82, %84, %80 : vector<16x128xi1>, vector<16x128xf32>
    %c2_i32 = arith.constant 2 : i32
    %86 = vector.broadcast %c2_i32 : i32 to vector<16x128xi32>
    %87 = arith.cmpi eq, %79, %86 : vector<16x128xi32>
    %88 = arith.sitofp %52 : vector<16x1xi32> to vector<16x1xf32>
    %89 = vector.shape_cast %88 : vector<16x1xf32> to vector<16x1xf32>
    %90 = vector.broadcast %89 : vector<16x1xf32> to vector<16x128xf32>
    %91 = arith.select %87, %90, %85 : vector<16x128xi1>, vector<16x128xf32>
    %c1_i32 = arith.constant 1 : i32
    %92 = vector.broadcast %c1_i32 : i32 to vector<16x128xi32>
    %93 = arith.cmpi eq, %79, %92 : vector<16x128xi32>
    %94 = vector.shape_cast %78 : vector<16x1xf32> to vector<16x1xf32>
    %95 = vector.broadcast %94 : vector<16x1xf32> to vector<16x128xf32>
    %96 = arith.select %93, %95, %91 : vector<16x128xi1>, vector<16x128xf32>
    %c3_i32 = arith.constant 3 : i32
    %97 = vector.broadcast %c3_i32 : i32 to vector<16x128xi32>
    %98 = arith.cmpi eq, %79, %97 : vector<16x128xi32>
    %99 = arith.sitofp %64 : vector<16x1xi32> to vector<16x1xf32>
    %100 = vector.shape_cast %99 : vector<16x1xf32> to vector<16x1xf32>
    %101 = vector.broadcast %100 : vector<16x1xf32> to vector<16x128xf32>
    %102 = arith.select %98, %101, %96 : vector<16x128xi1>, vector<16x128xf32>
    %c0_20 = arith.constant 0 : index
    %c0_21 = arith.constant 0 : index
    %103 = vector.load %arg5[%c0_20, %c0_21] : memref<16x128xf32, #tpu.memory_space<vmem>>, vector<16x128xf32>
    tpu.vector_store %arg5[%c0_20, %c0_21], %102 {strides = array<i32>} : memref<16x128xf32, #tpu.memory_space<vmem>>, vector<16x128xf32>,
    return
  }
  func.func @transform_0(%arg0: i32, %arg1: memref<1xi32, #tpu.memory_space<smem>>) -> (i32, i32) {
    %c0_i32 = arith.constant 0 : i32
    %c0_i32_0 = arith.constant 0 : i32
    return %arg0, %c0_i32 : i32, i32
  }
  func.func @transform_1(%arg0: i32, %arg1: memref<1xi32, #tpu.memory_space<smem>>) -> (i32, i32) {
    %c0_i32 = arith.constant 0 : i32
    %c0_i32_0 = arith.constant 0 : i32
    %c0_i32_1 = arith.constant 0 : i32
    return %c0_i32, %c0_i32_0 : i32, i32
  }
  func.func @transform_2(%arg0: i32, %arg1: memref<1xi32, #tpu.memory_space<smem>>) -> (i32, i32) {
    %c0_i32 = arith.constant 0 : i32
    %c0_i32_0 = arith.constant 0 : i32
    %c0_i32_1 = arith.constant 0 : i32
    return %c0_i32, %c0_i32_0 : i32, i32
  }
  func.func @transform_3(%arg0: i32, %arg1: memref<1xi32, #tpu.memory_space<smem>>) -> (i32, i32) {
    %c0_i32 = arith.constant 0 : i32
    %c0_i32_0 = arith.constant 0 : i32
    return %arg0, %c0_i32 : i32, i32
  }
}

</mosaic_0001>

<bundles_post_ra>
// kernel: tpu_custom_call.1
= control target key start
LH: loop header
LB: loop body
LE: loop exit
PB: predicated region body
PF: predicated region fallthrough
CT: control target
= control target key end

     0   :  { %10 = vsyncpa [#allocation5], 0  ;;  %s798_s0 = inlined_call_operand.<no memory space> [shape: s32[1], index: 0, kind: input, shape index: {}]   ;;  %s799_s1 = inlined_call_operand.hbm [shape: bf16[16,32], index: 1, kind: input, shape index: {}]   ;;  %s800_s2 = inlined_call_operand.hbm [shape: bf16[32,128], index: 2, kind: input, shape index: {}]   ;;  %s801_s3 = inlined_call_operand.hbm [shape: bf16[128,128], index: 3, kind: input, shape index: {}]   ;;  %s802_s4 = inlined_call_operand.hbm [shape: f32[16,128], index: 4, kind: output, shape index: {}]  }
   0x1   :  { %11 = vsyncpa [#allocation8], 0 }
   0x2   :  { %12 = vsyncpa [#allocation6], 0  ;;  %s613_s15 = smov [#allocation7]   ;;  %s614_s17 = smov [#allocation4]  }
   0x3   :  { %s30_s16 = sshll.u32 %s613_s15, 4  ;;  %s18_s18 = sshll.u32 %s614_s17, 4  ;;  %s31_s16 = int_to_ptr.vmem [resolvable:$true] %s30_s16  ;;  %s648_s18 = int_to_ptr.vmem [resolvable:$true] %s18_s18 }
   0x4   :  { %s519_s21 = scalar_lea.hbm %s800_s2, 256 }
   0x5   :  { %p520_p0 = scmp.ne.s32.totalorder %s800_s2, %s519_s21  ;;  %p523_p1 = scmp.lt.u32.totalorder %s519_s21, %s800_s2 }
   0x7   :  { %p525_p2 = pnand %p523_p1, %p520_p0 }
   0x9   :  { %528 = shalt.err (!%p525_p2)
}
   0xa   :  { %s529_s26 = scalar_lea.vmem %s31_s16, 256  ;;  %p534_p4 = scmp.lt.s32.totalorder %s31_s16, %s31_s16 }
   0xb   :  { %p530_p3 = scmp.ne.s32.totalorder %s31_s16, %s529_s26  ;;  %p535_p5 = scmp.lt.s32.totalorder %s529_s26, %s529_s26 }
   0xd   :  { %p536_p6 = por %p535_p5, %p534_p4 }
   0xf   :  { %p537_p7 = pnand %p536_p6, %p530_p3 }
  0x11   :  { %540 = shalt.err (!%p537_p7)
}
  0x12   :  { %s615_s27 = smov 64   ;;  %s616_s28 = smov 4  }
  0x13   :  { %36 = dma.hbm_to_vmem [thread:$0]  %s800_s2, 256, %s31_s16, [#allocation8], %s615_s27, %s615_s27, %s616_s28  }
  0x14   :  { %s541_s7 = scalar_lea.hbm %s799_s1, 128 }
  0x15   :  { %p542_p8 = scmp.ne.s32.totalorder %s799_s1, %s541_s7  ;;  %p545_p9 = scmp.lt.u32.totalorder %s541_s7, %s799_s1 }
  0x17   :  { %p547_p10 = pnand %p545_p9, %p542_p8 }
  0x19   :  { %550 = shalt.err (!%p547_p10)
}
  0x1a   :  { %s551_s12 = scalar_lea.vmem %s648_s18, 128  ;;  %p556_p12 = scmp.lt.s32.totalorder %s648_s18, %s648_s18 }
  0x1b   :  { %p552_p11 = scmp.ne.s32.totalorder %s648_s18, %s551_s12  ;;  %p557_p13 = scmp.lt.s32.totalorder %s551_s12, %s551_s12 }
  0x1d   :  { %p558_p0 = por %p557_p13, %p556_p12 }
  0x1f   :  { %p559_p1 = pnand %p558_p0, %p552_p11 }
  0x21   :  { %562 = shalt.err (!%p559_p1)
}
  0x22   :  { %24 = dma.hbm_to_vmem [thread:$0]  %s799_s1, 128, %s648_s18, [#allocation5], %s615_s27, %s615_s27, %s616_s28  }
  0x23   :  { %s617_s14 = smov [#allocation9]   ;;  %s563_s19 = scalar_lea.hbm %s801_s3, 1024 }
  0x24   :  { %s42_s15 = sshll.u32 %s617_s14, 4  ;;  %p564_p2 = scmp.ne.s32.totalorder %s801_s3, %s563_s19  ;;  %s43_s15 = int_to_ptr.vmem [resolvable:$true] %s42_s15 }
  0x25   :  { %p567_p3 = scmp.lt.u32.totalorder %s563_s19, %s801_s3 }
  0x27   :  { %p569_p4 = pnand %p567_p3, %p564_p2 }
  0x29   :  { %572 = shalt.err (!%p569_p4)
}
  0x2a   :  { %s573_s24 = scalar_lea.vmem %s43_s15, 1024  ;;  %p578_p6 = scmp.lt.s32.totalorder %s43_s15, %s43_s15 }
  0x2b   :  { %p574_p5 = scmp.ne.s32.totalorder %s43_s15, %s573_s24  ;;  %p579_p7 = scmp.lt.s32.totalorder %s573_s24, %s573_s24 }
  0x2d   :  { %p580_p8 = por %p579_p7, %p578_p6 }
  0x2f   :  { %p581_p9 = pnand %p580_p8, %p574_p5 }
  0x31   :  { %584 = shalt.err (!%p581_p9)
}
  0x32   :  { %48 = dma.hbm_to_vmem [thread:$0]  %s801_s3, 1024, %s43_s15, [#allocation8], %s615_s27, %s615_s27, %s616_s28  }
  0x33   :  { %607 = dma.done.wait [#allocation5], 128  }
  0x34   :  { %608 = vsyncadd [#allocation5], 4294967168 }
  0x35   :  { %609 = dma.done.wait [#allocation8], 1280  }
  0x36   :  { %610 = vsyncadd [#allocation8], 4294966016  ;;  %v235_v0 = vlaneseq  ;;  %v618_v1 = vmov 0.0   ;;  %vm619_vm0 = vmmov 0   ;;  %s249_s29 = smul.u32 2654435769, %s798_s0 }
  0x37   :  { %454 = vmatprep.subr.bf16.mxu0 %v618_v1  ;;  %458 = vmatprep.mubr.msk.bf16.mxu0 %vm619_vm0, %v618_v1  ;;  %v492_v9 = vld [vmem:[#allocation7] sm:$0xff]   ;;  %v493_v12 = vld [vmem:[#allocation7 + $0x8] sm:$0xff]   ;;  %vm82_vm1 = vcmask 261120   ;;  %v494_v15 = vld [vmem:[#allocation4] sm:$0xff]   ;;  %s620_s0 = smov [#allocation10]  }
  0x38   :  { %v236_v2 = vshrl.u32 %v235_v0, 7  ;;  %v705_v3 = vand.u32 127, %v235_v0  ;;  %462 = vmatprep.subr.bf16.mxu1 %v618_v1  ;;  %478 = vmatprep.mubr.msk.bf16.mxu1 %vm619_vm0, %v618_v1  ;;  %v250_v6 = vstv %s249_s29  ;;  %v495_v43 = vld [vmem:[#allocation9] sm:$0xff]   ;;  %v496_v44 = vld [vmem:[#allocation9 + $0x8] sm:$0xff]   ;;  %v497_v45 = vld [vmem:[#allocation9 + $0x10] sm:$0xff]   ;;  %s409_s3 = sshll.u32 %s620_s0, 4  ;;  %s410_s3 = int_to_ptr.vmem [resolvable:$true] %s409_s3 }
  0x39   :  { %455 = vmatpush3.bf16.msra.mxu0 %v492_v9  ;;  %463 = vmatpush3.bf16.msra.mxu1 %v495_v43  ;;  %v498_v46 = vld [vmem:[#allocation9 + $0x18] sm:$0xff]   ;;  %v499_v47 = vld [vmem:[#allocation9 + $0x20] sm:$0xff]   ;;  %v500_v48 = vld [vmem:[#allocation9 + $0x28] sm:$0xff]   ;;  %s585_s27 = scalar_lea.vmem %s410_s3, 256  ;;  %p590_p11 = scmp.lt.s32.totalorder %s410_s3, %s410_s3 }
  0x3a   :  { %v244_v4 = vmul.u32 128, %v236_v2  ;;  %v237_v5 = vadd.s32 8, %v236_v2  ;;  %456 = vmatprep.subr.bf16.mxu0 %v618_v1  ;;  %vm283_vm2 = vcmp.lt.s32.totalorder %v705_v3, 8  ;;  %464 = vmatprep.subr.bf16.mxu1 %v618_v1  ;;  %v501_v49 = vld [vmem:[#allocation9 + $0x30] sm:$0xff]   ;;  %v502_v50 = vld [vmem:[#allocation9 + $0x38] sm:$0xff]   ;;  %vm386_vm11 = vcmp.eq.s32.totalorder %v705_v3, 0  ;;  %p586_p10 = scmp.ne.s32.totalorder %s410_s3, %s585_s27  ;;  %p591_p12 = scmp.lt.s32.totalorder %s585_s27, %s585_s27 }
  0x3b   :  { %vm389_vm12 = vcmp.eq.s32.totalorder %v705_v3, 2  ;;  %vm394_vm13 = vcmp.eq.s32.totalorder %v705_v3, 1  ;;  %vm397_vm14 = vcmp.eq.s32.totalorder %v705_v3, 3 }
  0x3c   :  { %v246_v7 = vadd.s32 %v244_v4, %v705_v3  ;;  %v245_v8 = vmul.u32 128, %v237_v5  ;;  %p592_p13 = por %p591_p12, %p590_p11 }
  0x3d   :  { %457 = vmatpush3.bf16.msra.mxu0 %v493_v12  ;;  %465 = vmatpush3.bf16.msra.mxu1 %v496_v44 }
  0x3e   :  { %v251_v10 = vadd.s32 %v250_v6, %v246_v7  ;;  %v247_v11 = vadd.s32 %v245_v8, %v705_v3  ;;  %466 = vmatprep.subr.bf16.mxu1 %v618_v1  ;;  %p593_p0 = pnand %p592_p13, %p586_p10 }
  0x40   :  { %v434_v13 = vshrl.u32 %v251_v10, 16  ;;  %v252_v14 = vadd.s32 %v250_v6, %v247_v11  ;;  %459 = vmatmul.mubr.msk.bf16.vlgmr.msra.gmra.mrb[0].mxu0 %vm82_vm1, %v494_v15 }
  0x41   :  { %467 = vmatpush3.bf16.msra.mxu1 %v497_v45 }
  0x42   :  { %v257_v16 = vxor.u32 %v434_v13, %v251_v10  ;;  %v435_v17 = vshrl.u32 %v252_v14, 16  ;;  %468 = vmatprep.subr.bf16.mxu1 %v618_v1 }
  0x44   :  { %v259_v18 = vmul.u32 2146121005, %v257_v16  ;;  %v258_v19 = vxor.u32 %v435_v17, %v252_v14 }
  0x45   :  { %469 = vmatpush3.bf16.msra.mxu1 %v498_v46 }
  0x46   :  { %v436_v20 = vshrl.u32 %v259_v18, 15  ;;  %v260_v21 = vmul.u32 2146121005, %v258_v19  ;;  %470 = vmatprep.subr.bf16.mxu1 %v618_v1 }
  0x48   :  { %v265_v22 = vxor.u32 %v436_v20, %v259_v18  ;;  %v437_v23 = vshrl.u32 %v260_v21, 15 }
  0x49   :  { %471 = vmatpush3.bf16.msra.mxu1 %v499_v47 }
  0x4a   :  { %v267_v24 = vmul.u32 2221713035, %v265_v22  ;;  %v266_v25 = vxor.u32 %v437_v23, %v260_v21  ;;  %472 = vmatprep.subr.bf16.mxu1 %v618_v1 }
  0x4c   :  { %v438_v26 = vshrl.u32 %v267_v24, 16  ;;  %v268_v27 = vmul.u32 2221713035, %v266_v25 }
  0x4d   :  { %473 = vmatpush3.bf16.msra.mxu1 %v500_v48 }
  0x4e   :  { %v273_v28 = vxor.u32 %v438_v26, %v267_v24  ;;  %v439_v29 = vshrl.u32 %v268_v27, 16  ;;  %474 = vmatprep.subr.bf16.mxu1 %v618_v1 }
  0x50   :  { %v440_v30 = vshrl.u32 %v273_v28, 8  ;;  %v274_v31 = vxor.u32 %v439_v29, %v268_v27 }
  0x51   :  { %475 = vmatpush3.bf16.msra.mxu1 %v501_v49 }
  0x52   :  { %v279_v32 = vshll.u32 %v440_v30, 7  ;;  %v441_v33 = vshrl.u32 %v274_v31, 8  ;;  %476 = vmatprep.subr.bf16.mxu1 %v618_v1 }
  0x54   :  { %v281_v34 = vor.u32 %v279_v32, %v705_v3  ;;  %v280_v35 = vshll.u32 %v441_v33, 7 }
  0x55   :  { %477 = vmatpush3.bf16.msra.mxu1 %v502_v50 }
  0x56   :  { %v714_v36 = vsel %vm283_vm2, %v281_v34, 4294967295  ;;  %v282_v37 = vor.u32 %v280_v35, %v705_v3 }
  0x57   :  { %v287_v38 = vshra.s32 %v714_v36, 16  ;;  %v286_v51 = vand.u32 65535, %v714_v36 }
  0x58   :  { %v718_v39 = vsel %vm283_vm2, %v282_v37, 4294967295 }
  0x59   :  { %v289_v40 = vcvt.s32.f32 %v287_v38  ;;  %v301_v41 = vshra.s32 %v718_v39, 16  ;;  %v288_v52 = vcvt.s32.f32 %v286_v51  ;;  %v300_v53 = vand.u32 65535, %v718_v39 }
  0x5b   :  { %290 = vmax.xlane.f32.xlu0 %v289_v40  ;;  %v303_v42 = vcvt.s32.f32 %v301_v41  ;;  %v302_v56 = vcvt.s32.f32 %v300_v53 }
  0x5f   :  { %304 = vmax.xlane.f32.xlu0 %v303_v42 }
  0xe8   :  { %v291_v54 = vpop.xlane.xlu0 %290 }
  0xe9   :  { %vm292_vm3 = vcmp.eq.f32.partialorder %v289_v40, %v291_v54  ;;  %v297_v2 = vcvt.f32.s32 %v291_v54 }
  0xea   :  { %v293_v55 = vsel %vm292_vm3, %v288_v52, -inf }
  0xeb   :  { %294 = vmax.xlane.f32.xlu1 %v293_v55  ;;  %v298_v5 = vshll.u32 %v297_v2, 16 }
  0xec   :  { %v305_v57 = vpop.xlane.xlu0 %304 }
  0xed   :  { %vm306_vm4 = vcmp.eq.f32.partialorder %v303_v42, %v305_v57  ;;  %v311_v6 = vcvt.f32.s32 %v305_v57 }
  0xee   :  { %v307_v58 = vsel %vm306_vm4, %v302_v56, -inf }
  0xef   :  { %308 = vmax.xlane.f32.xlu1 %v307_v58  ;;  %v312_v10 = vshll.u32 %v311_v6, 16 }
 0x113   :  { %v120_v59 = vpop.f32.mrb[0].mxu0 }
 0x114   :  { %503 = vtanh.f32 %v120_v59  ;;  %v460_v60 = vpop.f32.mrb[1].mxu0 }
 0x115   :  { %v123_v61 = vpop.f32.mrb[2].mxu0 }
 0x116   :  { %505 = vtanh.f32 %v123_v61  ;;  %v461_v62 = vpop.f32.mrb[3].mxu0 }
 0x11e   :  { %v504_v63 = vpop.eup %503 }
 0x120   :  { %v506_v0 = vpop.eup %505 }
 0x121   :  { %v129_v1 = vpack.c.bf16 %v506_v0, %v504_v63 }
 0x123   :  { %479 = vmatmul.mubr.bf16.vlgmr.msra.gmra.mrb[0].mxu1 %v129_v1 }
 0x178   :  { %v295_v4 = vpop.xlane.xlu1 %294 }
 0x179   :  { %v296_v7 = vcvt.f32.s32 %v295_v4 }
 0x17b   :  { %v730_v8 = vadd.s32 %v298_v5, %v296_v7 }
 0x17c   :  { %v309_v9 = vpop.xlane.xlu1 %308 }
 0x17d   :  { %v314_v11 = vand.u32 127, %v730_v8  ;;  %v310_v12 = vcvt.f32.s32 %v309_v9 }
 0x17f   :  { %v733_v13 = vadd.s32 %v312_v10, %v310_v12  ;;  %vm738_vm5 = vcmp.eq.s32.totalorder %v705_v3, %v314_v11  ;;  %v390_v12 = vcvt.s32.f32 %v314_v11 }
 0x180   :  { %v324_v15 = vsel %vm738_vm5, 4294967295, %v714_v36 }
 0x181   :  { %v315_v16 = vand.u32 127, %v733_v13  ;;  %v327_v17 = vshra.s32 %v324_v15, 16  ;;  %v326_v27 = vand.u32 65535, %v324_v15 }
 0x183   :  { %v329_v18 = vcvt.s32.f32 %v327_v17  ;;  %vm749_vm6 = vcmp.eq.s32.totalorder %v705_v3, %v315_v16  ;;  %v328_v29 = vcvt.s32.f32 %v326_v27  ;;  %v391_v8 = vcvt.s32.f32 %v315_v16 }
 0x184   :  { %v325_v20 = vsel %vm749_vm6, 4294967295, %v718_v39 }
 0x185   :  { %330 = vmax.xlane.f32.xlu0 %v329_v18  ;;  %v341_v21 = vshra.s32 %v325_v20, 16  ;;  %v340_v30 = vand.u32 65535, %v325_v20 }
 0x187   :  { %v343_v22 = vcvt.s32.f32 %v341_v21  ;;  %v342_v33 = vcvt.s32.f32 %v340_v30 }
 0x189   :  { %344 = vmax.xlane.f32.xlu1 %v343_v22 }
 0x1f6   :  { %v228_v23 = vpop.f32.mrb[0].mxu1 }
 0x1f7   :  { %v480_v24 = vpop.f32.mrb[1].mxu1  ;;  %v318_v35 = vsel %vm738_vm5, %v228_v23, 0.0 }
 0x1f8   :  { %v231_v25 = vpop.f32.mrb[2].mxu1 }
 0x1f9   :  { %v481_v26 = vpop.f32.mrb[3].mxu1  ;;  %v319_v36 = vsel %vm749_vm6, %v231_v25, 0.0 }
 0x212   :  { %v331_v28 = vpop.xlane.xlu0 %330 }
 0x213   :  { %vm332_vm7 = vcmp.eq.f32.partialorder %v329_v18, %v331_v28  ;;  %v337_v37 = vcvt.f32.s32 %v331_v28 }
 0x214   :  { %v333_v31 = vsel %vm332_vm7, %v328_v29, -inf }
 0x215   :  { %334 = vmax.xlane.f32.xlu0 %v333_v31  ;;  %v338_v39 = vshll.u32 %v337_v37, 16 }
 0x216   :  { %v345_v32 = vpop.xlane.xlu1 %344 }
 0x217   :  { %vm346_vm8 = vcmp.eq.f32.partialorder %v343_v22, %v345_v32  ;;  %v351_v40 = vcvt.f32.s32 %v345_v32 }
 0x218   :  { %v347_v34 = vsel %vm346_vm8, %v342_v33, -inf }
 0x219   :  { %348 = vmax.xlane.f32.xlu1 %v347_v34  ;;  %320 = vadd.xlane.f32.xlu0 %v318_v35  ;;  %v352_v44 = vshll.u32 %v351_v40, 16 }
 0x21d   :  { %322 = vadd.xlane.f32.xlu1 %v319_v36 }
 0x2a2   :  { %v335_v38 = vpop.xlane.xlu0 %334 }
 0x2a3   :  { %v336_v41 = vcvt.f32.s32 %v335_v38 }
 0x2a5   :  { %v339_v42 = vadd.s32 %v338_v39, %v336_v41 }
 0x2a6   :  { %v349_v43 = vpop.xlane.xlu1 %348  ;;  %v321_v51 = vpop.xlane.xlu0 %320 }
 0x2a7   :  { %v354_v45 = vand.u32 127, %v339_v42  ;;  %v350_v46 = vcvt.f32.s32 %v349_v43 }
 0x2a9   :  { %v353_v47 = vadd.s32 %v352_v44, %v350_v46  ;;  %vm356_vm9 = vcmp.eq.s32.totalorder %v705_v3, %v354_v45  ;;  %v398_v18 = vcvt.s32.f32 %v354_v45 }
 0x2aa   :  { %v358_v48 = vsel %vm356_vm9, %v228_v23, 0.0  ;;  %v323_v52 = vpop.xlane.xlu1 %322 }
 0x2ab   :  { %v355_v49 = vand.u32 127, %v353_v47  ;;  %360 = vadd.xlane.f32.xlu0 %v358_v48 }
 0x2ad   :  { %vm357_vm10 = vcmp.eq.s32.totalorder %v705_v3, %v355_v49  ;;  %v399_v24 = vcvt.s32.f32 %v355_v49 }
 0x2ae   :  { %v359_v50 = vsel %vm357_vm10, %v231_v25, 0.0 }
 0x2af   :  { %362 = vadd.xlane.f32.xlu1 %v359_v50 }
 0x338   :  { %v361_v53 = vpop.xlane.xlu0 %360 }
 0x339   :  { %v364_v54 = vmax.f32 %v321_v51, %v361_v53 }
 0x33b   :  { %v366_v55 = vsub.f32 %v321_v51, %v364_v54  ;;  %v372_v56 = vsub.f32 %v361_v53, %v364_v54 }
 0x33c   :  { %v363_v57 = vpop.xlane.xlu1 %362 }
 0x33d   :  { %v368_v58 = vmul.f32 1.442695, %v366_v55  ;;  %v374_v59 = vmul.f32 1.442695, %v372_v56  ;;  %v365_v60 = vmax.f32 %v323_v52, %v363_v57 }
 0x33f   :  { %507 = vpow2.f32 %v368_v58  ;;  %v367_v61 = vsub.f32 %v323_v52, %v365_v60  ;;  %v373_v62 = vsub.f32 %v363_v57, %v365_v60 }
 0x340   :  { %509 = vpow2.f32 %v374_v59 }
 0x341   :  { %v370_v63 = vmul.f32 1.442695, %v367_v61  ;;  %v376_v0 = vmul.f32 1.442695, %v373_v62 }
 0x343   :  { %511 = vpow2.f32 %v370_v63 }
 0x344   :  { %513 = vpow2.f32 %v376_v0 }
 0x349   :  { %v508_v1 = vpop.eup %507 }
 0x34a   :  { %v510_v2 = vpop.eup %509 }
 0x34b   :  { %v378_v4 = vadd.f32 %v510_v2, %v508_v1 }
 0x34d   :  { %v512_v5 = vpop.eup %511  ;;  %515 = vrcp.f32 %v378_v4 }
 0x34e   :  { %v514_v6 = vpop.eup %513 }
 0x34f   :  { %v379_v7 = vadd.f32 %v514_v6, %v512_v5 }
 0x351   :  { %517 = vrcp.f32 %v379_v7 }
 0x357   :  { %v516_v9 = vpop.eup %515 }
 0x358   :  { %v381_v10 = vmul.f32 %v516_v9, %v508_v1  ;;  %v384_v14 = vmul.f32 %v516_v9, %v510_v2 }
 0x35a   :  { %v387_v15 = vsel %vm386_vm11, %v381_v10, 0.0 }
 0x35b   :  { %v518_v17 = vpop.eup %517  ;;  %v392_v19 = vsel %vm389_vm12, %v390_v12, %v387_v15 }
 0x35c   :  { %v383_v20 = vmul.f32 %v518_v17, %v512_v5  ;;  %v395_v21 = vsel %vm394_vm13, %v384_v14, %v392_v19  ;;  %v385_v22 = vmul.f32 %v518_v17, %v514_v6 }
 0x35d   :  { %v400_v11 = vsel %vm397_vm14, %v398_v18, %v395_v21 }
 0x35e   :  { %v388_v23 = vsel %vm386_vm11, %v383_v20, 0.0  ;;  %402 = vst [vmem:[#allocation10] sm:$0xff] %v400_v11 }
 0x35f   :  { %v393_v25 = vsel %vm389_vm12, %v391_v8, %v388_v23 }
 0x360   :  { %v396_v26 = vsel %vm394_vm13, %v385_v22, %v393_v25 }
 0x361   :  { %v401_v13 = vsel %vm397_vm14, %v399_v24, %v396_v26 }
 0x362   :  { %403 = vst [vmem:[#allocation10 + $0x8] sm:$0xff] %v401_v13 }
 0x363   :  { %596 = shalt.err (!%p593_p0)
}
 0x364   :  { %s597_s5 = scalar_lea.hbm %s802_s4, 256 }
 0x365   :  { %p598_p1 = scmp.ne.s32.totalorder %s802_s4, %s597_s5  ;;  %p601_p2 = scmp.lt.u32.totalorder %s597_s5, %s802_s4 }
 0x367   :  { %p603_p3 = pnand %p601_p2, %p598_p1 }
 0x369   :  { %606 = shalt.err (!%p603_p3)
}
 0x36a   :  { %s621_s10 = smov 128   ;;  %s622_s11 = smov 8  }
 0x36b   :  { %415 = dma.vmem_to_hbm [thread:$0]  %s410_s3, 256, %s802_s4, [#allocation6], %s621_s10, %s621_s10, %s622_s11  }
 0x36c   :  { %611 = dma.done.wait [#allocation6], 256  }
 0x36d   :  { %612 = vsyncadd [#allocation6], 4294967040 }
 0x36e   :  { %419 = vsyncpa [#allocation5], 1 }
 0x36f   :  { %420 = vsyncpa [#allocation8], 1 }
 0x370   :  { %421 = vsyncpa [#allocation6], 1 }

</bundles_post_ra>
